<compile_context>
chip_gen: v6e
topology: v6e:2x2x1
jax: 0.10.0
libtpu: 0.0.40
codegen_flags: <defaults>
</compile_context>

<pallas_src>
import jax
import jax.numpy as jnp
from jax.experimental import pallas as pl
from jax.experimental.pallas import tpu as pltpu


def _mlp_kernel(xt_ref,              # (8, TB)    bf16, batch on lanes
                w1_ref, b1_ref,      # (50, 8)   bf16, (50, 1)  f32
                w2_ref, b2_ref,      # (100, 50) bf16, (100, 1) f32
                w34_ref, b34_ref,    # (100, 1)  f32,  (1, 1)   f32 (folded tail)
                o_ref):              # (1, TB)    f32, batch on lanes
    # Linear(8, 50) + ReLU  -> (50, TB); bf16 MXU, f32 accumulate.
    h1 = jnp.dot(w1_ref[...], xt_ref[...],
                 preferred_element_type=jnp.float32) + b1_ref[...]
    h1 = jnp.maximum(h1, 0.0)

    # Linear(50, 100) + ReLU -> (100, TB); bf16 MXU, f32 accumulate.
    h2 = jnp.dot(w2_ref[...], h1.astype(jnp.bfloat16),
                 preferred_element_type=jnp.float32) + b2_ref[...]
    h2 = jnp.maximum(h2, 0.0)

    # Folded Linear(100, 5) @ Linear(5, 1): a single output row.  Done on the
    # idle VPU (broadcast multiply) + XLU (cross-sublane reduce) instead of
    # spending full-width MXU pushes on a 1-row matmul.
    o_ref[...] = (jnp.sum(w34_ref[...] * h2, axis=0, keepdims=True)
                  + b34_ref[...])


def small_neural_network(x, params, tb=8192):
    """Forward pass of SmallNeuralNetwork.

    x: (B, 8) float32 -> (B, 1) float32.
    params: list of (W, b) in PyTorch layout, W: (out, in), b: (out, 1).
    tb: batch tile; rounded down to a multiple of 128 and clamped so the grid
        has >= 2 steps whenever B > 128 (lets v7x's two TensorCores share work).
    """
    (w1, b1), (w2, b2), (w3, b3), (w4, b4) = params
    B = x.shape[0]

    # Fold the two activation-free tail layers (exact up to f32 roundoff).
    w34_col = jnp.dot(w4, w3, preferred_element_type=jnp.float32).T      # (100, 1)
    b34 = jnp.dot(w4, b3, preferred_element_type=jnp.float32) + b4       # (1, 1)

    # bf16 operands for the MXU matmuls; biases and the VPU/XLU tail stay f32.
    w1_bf = w1.astype(jnp.bfloat16)
    w2_bf = w2.astype(jnp.bfloat16)

    # Batch tile: round DOWN to a multiple of 128, then clamp so there are at
    # least 2 grid steps whenever B > 128.
    tb = max(128, (int(tb) // 128) * 128)
    half_up = max(128, pl.cdiv(pl.cdiv(B, 2), 128) * 128)
    tb = min(tb, half_up)
    n_tiles = pl.cdiv(B, tb)
    b_pad = n_tiles * tb

    # Layout plumbing (wrapper side): batch onto the lane axis; bf16 halves the
    # transpose/pad HBM traffic relative to the previous f32 version.
    xt = x.astype(jnp.bfloat16).T                                        # (8, B)
    if b_pad != B:
        xt = jnp.pad(xt, ((0, 0), (0, b_pad - B)))                       # (8, b_pad)
    # TODO(synk): loading (tb, 8) blocks and transposing in-kernel (XLU slack)
    # would remove this wrapper transpose/pad entirely.

    def _tile_map(i):
        return (0, i)

    def _resident(i):
        return (0, 0)

    flops = 2 * b_pad * (50 * 8 + 100 * 50 + 100)
    bytes_accessed = (xt.size * 2 + b_pad * 4
                      + (w1_bf.size + w2_bf.size) * 2
                      + (b1.size + b2.size + w34_col.size + b34.size) * 4)

    out_row = pl.pallas_call(
        _mlp_kernel,
        out_shape=jax.ShapeDtypeStruct((1, b_pad), jnp.float32),
        grid=(n_tiles,),
        in_specs=[
            pl.BlockSpec((8, tb), _tile_map),       # x^T tile (bf16)
            pl.BlockSpec((50, 8), _resident),       # W1 (bf16), VMEM-resident
            pl.BlockSpec((50, 1), _resident),       # b1
            pl.BlockSpec((100, 50), _resident),     # W2 (bf16)
            pl.BlockSpec((100, 1), _resident),      # b2
            pl.BlockSpec((100, 1), _resident),      # folded W34 column
            pl.BlockSpec((1, 1), _resident),        # folded b34
        ],
        out_specs=pl.BlockSpec((1, tb), _tile_map),
        compiler_params=pltpu.CompilerParams(
            dimension_semantics=("parallel",)),
        cost_estimate=pl.CostEstimate(
            flops=flops, transcendentals=0, bytes_accessed=bytes_accessed),
    )(xt, w1_bf, b1, w2_bf, b2, w34_col, b34)

    # Padded batch columns carry garbage (ReLU(b1) propagates); slice them off.
    return out_row[0, :B].reshape(B, 1)


def init_params(key):
    """Deterministic init mirroring PyTorch nn.Linear default (U(-1/sqrt(in), 1/sqrt(in))).

    Weights are kept in PyTorch layout: W (out_features, in_features), b (out_features, 1).
    """
    dims = [(8, 50), (50, 100), (100, 5), (5, 1)]
    params = []
    for (fan_in, fan_out) in dims:
        key, kw, kb = jax.random.split(key, 3)
        bound = 1.0 / (fan_in ** 0.5)
        w = jax.random.uniform(kw, (fan_out, fan_in), jnp.float32, -bound, bound)
        b = jax.random.uniform(kb, (fan_out, 1), jnp.float32, -bound, bound)
        params.append((w, b))
    return params


def _reference_forward(x, params):
    h = x
    for i, (w, b) in enumerate(params):
        h = h @ w.T + b.T
        if i < 2:  # ReLU after the first two Linear layers only
            h = jnp.maximum(h, 0.0)
    return h


if __name__ == "__main__":
    key = jax.random.PRNGKey(0)
    key, kx = jax.random.split(key)

    # Small test batch; with the default tb the >=2-step clamp makes tb=256, so
    # this exercises multi-step tiling + batch padding (300 -> 512 lanes).
    batch = 300
    x = jax.random.normal(kx, (batch, 8), jnp.float32)
    params = init_params(key)

    out = small_neural_network(x, params)
    out = jax.block_until_ready(out)

    ref = _reference_forward(x, params)
    assert out.shape == (batch, 1), out.shape
    # bf16 matmul operands + folded tail change rounding vs the f32 reference.
    assert jnp.allclose(out, ref, atol=5e-2, rtol=5e-2), "mismatch vs reference"

    print("KERNEL_OK")
</pallas_src>

<mosaic_0001>
module attributes {stable_mosaic.version = 11 : i64} {
  func.func @_mlp_kernel(%arg0: i32, %arg1: memref<8x256xbf16, #tpu.memory_space<vmem>>, %arg2: memref<50x8xbf16, #tpu.memory_space<vmem>>, %arg3: memref<50x1xf32, #tpu.memory_space<vmem>>, %arg4: memref<100x50xbf16, #tpu.memory_space<vmem>>, %arg5: memref<100x1xf32, #tpu.memory_space<vmem>>, %arg6: memref<100x1xf32, #tpu.memory_space<vmem>>, %arg7: memref<1x1xf32, #tpu.memory_space<vmem>>, %arg8: memref<1x256xf32, #tpu.memory_space<vmem>>) attributes {dimension_semantics = [#tpu.dimension_semantics<parallel>], iteration_bounds = array<i64: 2>, scalar_prefetch = 0 : i64, scratch_operands = 0 : i64, tpu.core_type = #tpu.core_type<tc>, window_params = [{transform_indices = @transform_0, window_bounds = array<i64: 8, 256>}, {pipeline_mode = #tpu.pipeline_mode<synchronous>, transform_indices = @transform_1, window_bounds = array<i64: 50, 8>}, {pipeline_mode = #tpu.pipeline_mode<synchronous>, transform_indices = @transform_2, window_bounds = array<i64: 50, 1>}, {pipeline_mode = #tpu.pipeline_mode<synchronous>, transform_indices = @transform_3, window_bounds = array<i64: 100, 50>}, {pipeline_mode = #tpu.pipeline_mode<synchronous>, transform_indices = @transform_4, window_bounds = array<i64: 100, 1>}, {pipeline_mode = #tpu.pipeline_mode<synchronous>, transform_indices = @transform_5, window_bounds = array<i64: 100, 1>}, {pipeline_mode = #tpu.pipeline_mode<synchronous>, transform_indices = @transform_6, window_bounds = array<i64: 1, 1>}, {transform_indices = @transform_7, window_bounds = array<i64: 1, 256>}]} {
    %c0 = arith.constant 0 : index
    %c0_0 = arith.constant 0 : index
    %0 = vector.load %arg2[%c0, %c0_0] : memref<50x8xbf16, #tpu.memory_space<vmem>>, vector<50x8xbf16>
    %c0_1 = arith.constant 0 : index
    %c0_2 = arith.constant 0 : index
    %1 = vector.load %arg1[%c0_1, %c0_2] : memref<8x256xbf16, #tpu.memory_space<vmem>>, vector<8x256xbf16>
    %cst = arith.constant dense<0.000000e+00> : vector<50x256xf32>
    %2 = tpu.matmul %0, %1, %cst {dimension_numbers = #tpu.dot_dimension_numbers<[1], [0], [0], [1], [0, 0, 1, 1], [], []>} : vector<50x8xbf16>, vector<8x256xbf16>, vector<50x256xf32> -> vector<50x256xf32>
    %c0_3 = arith.constant 0 : index
    %c0_4 = arith.constant 0 : index
    %3 = vector.load %arg3[%c0_3, %c0_4] : memref<50x1xf32, #tpu.memory_space<vmem>>, vector<50x1xf32>
    %4 = vector.broadcast %3 : vector<50x1xf32> to vector<50x256xf32>
    %5 = arith.addf %2, %4 : vector<50x256xf32>
    %cst_5 = arith.constant 0.000000e+00 : f32
    %6 = vector.broadcast %cst_5 : f32 to vector<50x256xf32>
    %7 = arith.maximumf %5, %6 : vector<50x256xf32>
    %c0_6 = arith.constant 0 : index
    %c0_7 = arith.constant 0 : index
    %8 = vector.load %arg4[%c0_6, %c0_7] : memref<100x50xbf16, #tpu.memory_space<vmem>>, vector<100x50xbf16>
    %9 = arith.truncf %7 : vector<50x256xf32> to vector<50x256xbf16>
    %cst_8 = arith.constant dense<0.000000e+00> : vector<100x256xf32>
    %10 = tpu.matmul %8, %9, %cst_8 {dimension_numbers = #tpu.dot_dimension_numbers<[1], [0], [0], [1], [0, 0, 1, 1], [], []>} : vector<100x50xbf16>, vector<50x256xbf16>, vector<100x256xf32> -> vector<100x256xf32>
    %c0_9 = arith.constant 0 : index
    %c0_10 = arith.constant 0 : index
    %11 = vector.load %arg5[%c0_9, %c0_10] : memref<100x1xf32, #tpu.memory_space<vmem>>, vector<100x1xf32>
    %12 = vector.broadcast %11 : vector<100x1xf32> to vector<100x256xf32>
    %13 = arith.addf %10, %12 : vector<100x256xf32>
    %cst_11 = arith.constant 0.000000e+00 : f32
    %14 = vector.broadcast %cst_11 : f32 to vector<100x256xf32>
    %15 = arith.maximumf %13, %14 : vector<100x256xf32>
    %c0_12 = arith.constant 0 : index
    %c0_13 = arith.constant 0 : index
    %16 = vector.load %arg6[%c0_12, %c0_13] : memref<100x1xf32, #tpu.memory_space<vmem>>, vector<100x1xf32>
    %17 = vector.broadcast %16 : vector<100x1xf32> to vector<100x256xf32>
    %18 = arith.mulf %17, %15 : vector<100x256xf32>
    %cst_14 = arith.constant dense<0.000000e+00> : vector<256xf32>
    %19 = vector.multi_reduction <add>, %18, %cst_14 [0] : vector<100x256xf32> to vector<256xf32>
    %20 = vector.shape_cast %19 : vector<256xf32> to vector<1x256xf32>
    %c0_15 = arith.constant 0 : index
    %c0_16 = arith.constant 0 : index
    %21 = vector.load %arg7[%c0_15, %c0_16] : memref<1x1xf32, #tpu.memory_space<vmem>>, vector<1x1xf32>
    %22 = vector.broadcast %21 : vector<1x1xf32> to vector<1x256xf32>
    %23 = arith.addf %20, %22 : vector<1x256xf32>
    %c0_17 = arith.constant 0 : index
    %c0_18 = arith.constant 0 : index
    %24 = vector.load %arg8[%c0_17, %c0_18] : memref<1x256xf32, #tpu.memory_space<vmem>>, vector<1x256xf32>
    tpu.vector_store %arg8[%c0_17, %c0_18], %23 {strides = array<i32>} : memref<1x256xf32, #tpu.memory_space<vmem>>, vector<1x256xf32>,
    return
  }
  func.func @transform_0(%arg0: i32) -> (i32, i32) {
    %c0_i32 = arith.constant 0 : i32
    %c0_i32_0 = arith.constant 0 : i32
    return %c0_i32, %arg0 : i32, i32
  }
  func.func @transform_1(%arg0: i32) -> (i32, i32) {
    %c0_i32 = arith.constant 0 : i32
    %c0_i32_0 = arith.constant 0 : i32
    %c0_i32_1 = arith.constant 0 : i32
    return %c0_i32, %c0_i32_0 : i32, i32
  }
  func.func @transform_2(%arg0: i32) -> (i32, i32) {
    %c0_i32 = arith.constant 0 : i32
    %c0_i32_0 = arith.constant 0 : i32
    %c0_i32_1 = arith.constant 0 : i32
    return %c0_i32, %c0_i32_0 : i32, i32
  }
  func.func @transform_3(%arg0: i32) -> (i32, i32) {
    %c0_i32 = arith.constant 0 : i32
    %c0_i32_0 = arith.constant 0 : i32
    %c0_i32_1 = arith.constant 0 : i32
    return %c0_i32, %c0_i32_0 : i32, i32
  }
  func.func @transform_4(%arg0: i32) -> (i32, i32) {
    %c0_i32 = arith.constant 0 : i32
    %c0_i32_0 = arith.constant 0 : i32
    %c0_i32_1 = arith.constant 0 : i32
    return %c0_i32, %c0_i32_0 : i32, i32
  }
  func.func @transform_5(%arg0: i32) -> (i32, i32) {
    %c0_i32 = arith.constant 0 : i32
    %c0_i32_0 = arith.constant 0 : i32
    %c0_i32_1 = arith.constant 0 : i32
    return %c0_i32, %c0_i32_0 : i32, i32
  }
  func.func @transform_6(%arg0: i32) -> (i32, i32) {
    %c0_i32 = arith.constant 0 : i32
    %c0_i32_0 = arith.constant 0 : i32
    %c0_i32_1 = arith.constant 0 : i32
    return %c0_i32, %c0_i32_0 : i32, i32
  }
  func.func @transform_7(%arg0: i32) -> (i32, i32) {
    %c0_i32 = arith.constant 0 : i32
    %c0_i32_0 = arith.constant 0 : i32
    return %c0_i32, %arg0 : i32, i32
  }
}

</mosaic_0001>

<bundles_post_ra>
// kernel: tpu_custom_call.1
= control target key start
LH: loop header
LB: loop body
LE: loop exit
PB: predicated region body
PF: predicated region fallthrough
CT: control target
= control target key end

     0   :  { %s1489_s0 = inlined_call_operand.vmem [shape: bf16[8,512], index: 0, kind: input, shape index: {}]   ;;  %s1490_s1 = inlined_call_operand.vmem [shape: bf16[50,8], index: 1, kind: input, shape index: {}]   ;;  %s1491_s2 = inlined_call_operand.vmem [shape: f32[50,1], index: 2, kind: input, shape index: {}]   ;;  %s1492_s3 = inlined_call_operand.vmem [shape: bf16[100,50], index: 3, kind: input, shape index: {}]   ;;  %s1493_s4 = inlined_call_operand.vmem [shape: f32[100,1], index: 4, kind: input, shape index: {}]   ;;  %s1494_s5 = inlined_call_operand.vmem [shape: f32[100,1], index: 5, kind: input, shape index: {}]   ;;  %s1495_s6 = inlined_call_operand.<no memory space> [shape: f32[1,1], index: 6, kind: input, shape index: {}]   ;;  %s1496_s7 = inlined_call_operand.hbm [shape: f32[1,512], index: 7, kind: output, shape index: {}]  }
   0x1   :  { %v12_v0 = vstv %s1495_s6 }
   0x2   :  { %13 = vst [vmem:[#allocation2] sm:$0x1] %v12_v0 }
   0x3   :  { %14 = vsyncpa [#allocation4], 0 }
   0x4   :  { %16 = vsyncpa [#allocation4 + $0x1], 0  ;;  %s1211_s26 = smov 0   ;;  %s1213_s27 = smov 0  }
   0x5   :  { %s1215_s28 = smov 0   ;;  %s1217_s29 = smov 0  }
   0x6 LB: > { %s1232_s6 = sadd.s32 4294967295, %s1163_s29   ;;  %s1000_s30 = sadd.s32 4294967294, %s1163_s29   ;;  %s1163_s29 = sphi %s1217_s29, %s1502_s29   ;;  %s1159_s28 = sphi %s1215_s28, %s1501_s28   ;;  %s1155_s27 = sphi %s1213_s27, %s1500_s27   ;;  %s1151_s26 = sphi %s1211_s26, %s1499_s26  }
   0x7   : > { %s1236_s8 = sadd.s32 1, %s1163_s29   ;;  %s181_s9 = sadd.s32 1, %s1159_s28 }
   0x8   : > { %s178_s10 = ssub.s32 %s1163_s29, %s1236_s8  ;;  %p191_p0 = scmp.ne.s32.totalorder %s1159_s28, %s1155_s27 }
   0x9   : > { %p179_p1 = scmp.eq.s32.totalorder %s178_s10, 0  ;;  %p192_p2 = scmp.eq.s32.totalorder %s1232_s6, 1 }
   0xa   : > { %p197_p3 = scmp.ne.s32.totalorder %s1155_s27, %s1151_s26  ;;  %p198_p4 = scmp.eq.s32.totalorder %s1000_s30, 1 }
   0xb   : > { %s1247_s11 = scalar_select %p179_p1, %s1159_s28, %s181_s9  }
   0xc   : > { %p1249_p5 = por %p192_p2, %p191_p0  ;;  %p1253_p6 = por %p198_p4, %p197_p3 }
   0xd   : > { %p1003_p7 = scmp.ge.s32.totalorder %s1163_s29, 1  ;;  %p243_p8 = scmp.lt.s32.totalorder %s1163_s29, 3 }
   0xf   : > { %p244_p9 = pnand %p1003_p7, %p243_p8 }
  0x10   : > { %s1005_s14 = sshll.u32 (!%p244_p9), %s1232_s6, 1  ;;  %s1038_s19 = sshll.u32 (!%p244_p9), %s1232_s6, 5 }
  0x11   : > { %247 = sbr.rel (%p244_p9) target bundleno = 543 (0x21f), region = 48  ;;  %p276_p10 = scmp.lt.s32.totalorder (!%p244_p9), %s1005_s14, 3 }
  0x12   : > { %s939_s24 = scalar_lea.hbm (!%p244_p9), %s1496_s7, %s1038_s19  ;;  %s1167_s9 = smov (!%p244_p9), [#allocation3]  }
  0x13   : > { %s1107_s10 = sshll.u32 (!%p244_p9), %s1167_s9, 4  ;;  %s1108_s10 = int_to_ptr.vmem [resolvable:$false] %s1107_s10 }
  0x14   : > { %s1109_s6 = scalar_lea.vmem (!%p244_p9), %s1108_s10, 64 }
  0x16   : > { %v1165_v1 = vmov 0   ;;  %s1504_s14 = smov (!%p276_p10, %s1005_s14), 3  ;;  %v297_v2 = vld [vmem:[%s1491_s2 + $0x30] sm:$0x3]  ;;  %v296_v3 = vld [vmem:[%s1491_s2 + $0x28] sm:$0xff]  ;;  %v295_v4 = vld [vmem:[%s1491_s2 + $0x20] sm:$0xff] }
  0x17   : > { %408 = vmatprep.mubr.bf16.mxu0 %v1165_v1  ;;  %1088 = vset.pattern.permute.xlu0 %v1165_v1  ;;  %s1006_s17 = sshll.u32 %s1504_s14, 2  ;;  %vm369_vm0 = vcmask 1043456   ;;  %v293_v6 = vld [vmem:[%s1491_s2 + $0x10] sm:$0xff]  ;;  %v1092_v10 = vld [vmem:[%s1490_s1] sm:$0xff]   ;;  %v294_v11 = vld [vmem:[%s1491_s2 + $0x18] sm:$0xff]  ;;  %vm356_vm1 = vcmask 64512  }
  0x18   : > { %1089 = vset.pattern.permute.xlu1 %v1165_v1  ;;  %674 = vmatprep.mubr.bf16.mxu1 %v1165_v1  ;;  %s279_s22 = scalar_lea.vmem %s1489_s0, %s1006_s17  ;;  %v291_v12 = vld [vmem:[%s1491_s2] sm:$0xff]  ;;  %v292_v13 = vld [vmem:[%s1491_s2 + $0x8] sm:$0xff]  ;;  %v484_v17 = vld [vmem:[%s1493_s4 + $0x10] sm:$0xff]  ;;  %vm615_vm2 = vcmask 1040384   ;;  %vm593_vm3 = vcmask 408576   ;;  %s272_s17 = sand.u32 1, %s1155_s27  }
  0x19   : > { %330 = vperm.xlu0 %1088, %v297_v2   ;;  %325 = vperm.xlu1 %1089, %v296_v3   ;;  %v290_v5 = vld [vmem:[%s279_s22] sm:$0xff]  ;;  %v1093_v15 = vld [vmem:[%s1490_s1 + $0x8] sm:$0xff]   ;;  %v485_v18 = vld [vmem:[%s1493_s4 + $0x18] sm:$0xff]  ;;  %s1004_s18 = sshll.u32 %s272_s17, 1  ;;  %s927_s25 = scalar_lea.sflag [#allocation4], %s272_s17 }
  0x1a   : > { %v1012_v7 = vcombine.high %v290_v5, %v290_v5  ;;  %v1011_v8 = vcombine.low %v290_v5, %v290_v5  ;;  %v482_v14 = vld [vmem:[%s1493_s4] sm:$0xff]  ;;  %v483_v16 = vld [vmem:[%s1493_s4 + $0x8] sm:$0xff]  ;;  %v1094_v20 = vld [vmem:[%s1490_s1 + $0x10] sm:$0xff]   ;;  %s274_s20 = scalar_lea.vmem [#allocation3], %s1004_s18 }
  0x1b   : > { %v749_v19 = vld [vmem:[%s1494_s5] sm:$0xff]  ;;  %v750_v21 = vld [vmem:[%s1494_s5 + $0x8] sm:$0xff]  ;;  %v751_v23 = vld [vmem:[%s1494_s5 + $0x10] sm:$0xff]  ;;  %s941_s21 = sshll.u32 %s274_s20, 4  ;;  %s942_s21 = int_to_ptr.vmem [resolvable:$true] %s941_s21 }
  0x1c   : > { %1013 = vmatprep.subr.msk.bf16.mxu0 %vm369_vm0, %v1012_v7  ;;  %v371_v9 = vsel %vm369_vm0, %v1011_v8, 0  ;;  %v486_v22 = vld [vmem:[%s1493_s4 + $0x20] sm:$0xff]  ;;  %v487_v24 = vld [vmem:[%s1493_s4 + $0x28] sm:$0xff]  ;;  %v1095_v25 = vld [vmem:[%s1490_s1 + $0x18] ss:$0 sps:$4 sm:$0x11]   ;;  %p1110_p0 = scmp.lt.s32.totalorder %s942_s21, %s1108_s10 }
  0x1d   : > { %320 = vperm.xlu0 %1088, %v295_v4   ;;  %310 = vperm.xlu1 %1089, %v293_v6   ;;  %v752_v26 = vld [vmem:[%s1494_s5 + $0x18] sm:$0xff]  ;;  %v488_v27 = vld [vmem:[%s1493_s4 + $0x30] sm:$0xff]  ;;  %v753_v28 = vld [vmem:[%s1494_s5 + $0x20] sm:$0xff]  ;;  %s1103_s30 = scalar_lea.vmem %s942_s21, 32 }
  0x1e   : > { %391 = vmatpush1.bf16.msra.mxu0 %v371_v9  ;;  %v489_v29 = vld [vmem:[%s1493_s4 + $0x38] sm:$0xff]  ;;  %v754_v30 = vld [vmem:[%s1494_s5 + $0x28] sm:$0xff]  ;;  %v490_v31 = vld [vmem:[%s1493_s4 + $0x40] sm:$0xff]  ;;  %p1104_p11 = scmp.ne.s32.totalorder %s942_s21, %s1103_s30  ;;  %p1111_p1 = scmp.lt.s32.totalorder %s1109_s6, %s1103_s30 }
  0x1f   : > { %v755_v32 = vld [vmem:[%s1494_s5 + $0x30] sm:$0xff]  ;;  %v491_v33 = vld [vmem:[%s1493_s4 + $0x48] sm:$0xff]  ;;  %v756_v34 = vld [vmem:[%s1494_s5 + $0x38] sm:$0xff] }
  0x20   : > { %v492_v35 = vld [vmem:[%s1493_s4 + $0x50] sm:$0xff]  ;;  %v757_v36 = vld [vmem:[%s1494_s5 + $0x40] sm:$0xff]  ;;  %v493_v37 = vld [vmem:[%s1493_s4 + $0x58] sm:$0xff]  ;;  %p1105_p12 = pnand %p1104_p11, %p1249_p5  ;;  %p1112_p2 = por %p1111_p1, %p1110_p0 }
  0x21   : > { %315 = vperm.xlu0 %1088, %v294_v11   ;;  %1014 = vmatmul.mubr.msk.bf16.vlgmr.msra.gmra.mxu0 %vm356_vm1, %v1092_v10  ;;  %v758_v38 = vld [vmem:[%s1494_s5 + $0x48] sm:$0xff]  ;;  %v494_v39 = vld [vmem:[%s1493_s4 + $0x60] sm:$0xf]  ;;  %v759_v40 = vld [vmem:[%s1494_s5 + $0x50] sm:$0xff] }
  0x22   : > { %300 = vperm.xlu1 %1089, %v291_v12   ;;  %418 = vmatprep.mubr.bf16.mxu0 %v1165_v1  ;;  %v760_v41 = vld [vmem:[%s1494_s5 + $0x58] sm:$0xff]  ;;  %v761_v42 = vld [vmem:[%s1494_s5 + $0x60] sm:$0xf]  ;;  %p1106_p13 = pneg %p1105_p12 }
  0x23   : > { %v891_v43 = vld [vmem:[#allocation2] sm:$0x1] }
  0x24   : > { %p1113_p3 = pnand %p1112_p2, %p1106_p13 }
  0x25   : > { %305 = vperm.xlu0 %1088, %v292_v13  }
  0x26   : > { %497 = vperm.xlu1 %1089, %v482_v14  }
  0x29   : > { %502 = vperm.xlu0 %1088, %v483_v16   ;;  %1015 = vmatmul.mubr.msk.bf16.gmra.mxu0 %vm356_vm1, %v1093_v15 }
  0x2a   : > { %507 = vperm.xlu1 %1089, %v484_v17   ;;  %428 = vmatprep.mubr.bf16.mxu0 %v1165_v1 }
  0x2d   : > { %512 = vperm.xlu0 %1088, %v485_v18  }
  0x2e   : > { %764 = vperm.xlu1 %1089, %v749_v19  }
  0x31   : > { %769 = vperm.xlu0 %1088, %v750_v21   ;;  %1016 = vmatmul.mubr.msk.bf16.gmra.mxu0 %vm356_vm1, %v1094_v20 }
  0x32   : > { %517 = vperm.xlu1 %1089, %v486_v22   ;;  %438 = vmatprep.mubr.bf16.mxu0 %v1165_v1 }
  0x35   : > { %774 = vperm.xlu0 %1088, %v751_v23  }
  0x36   : > { %522 = vperm.xlu1 %1089, %v487_v24  }
  0x39   : > { %779 = vperm.xlu0 %1088, %v752_v26   ;;  %1017 = vmatmul.mubr.msk.bf16.gmra.mxu0 %vm356_vm1, %v1095_v25 }
  0x3a   : > { %527 = vperm.xlu1 %1089, %v488_v27   ;;  %654 = vmatprep.mubr.bf16.mxu0 %v1165_v1 }
  0x3d   : > { %784 = vperm.xlu0 %1088, %v753_v28  }
  0x3e   : > { %532 = vperm.xlu1 %1089, %v489_v29  }
  0x41   : > { %789 = vperm.xlu0 %1088, %v754_v30  }
  0x42   : > { %537 = vperm.xlu1 %1089, %v490_v31  }
  0x45   : > { %794 = vperm.xlu0 %1088, %v755_v32  }
  0x46   : > { %542 = vperm.xlu1 %1089, %v491_v33  }
  0x49   : > { %799 = vperm.xlu0 %1088, %v756_v34  }
  0x4a   : > { %547 = vperm.xlu1 %1089, %v492_v35  }
  0x4d   : > { %804 = vperm.xlu0 %1088, %v757_v36  }
  0x4e   : > { %552 = vperm.xlu1 %1089, %v493_v37  }
  0x51   : > { %809 = vperm.xlu0 %1088, %v758_v38  }
  0x52   : > { %557 = vperm.xlu1 %1089, %v494_v39  }
  0x55   : > { %814 = vperm.xlu0 %1088, %v759_v40  }
  0x56   : > { %819 = vperm.xlu1 %1089, %v760_v41   ;;  %v1096_v41 = vld [vmem:[%s1492_s3] sm:$0xff]  }
  0x59   : > { %824 = vperm.xlu0 %1088, %v761_v42   ;;  %v1097_v42 = vld [vmem:[%s1492_s3 + $0x10] sm:$0xff]  }
  0x5a   : > { %894 = vperm.xlu1 %1089, %v891_v43   ;;  %v1098_v43 = vld [vmem:[%s1492_s3 + $0x8] sm:$0xff]  }
  0x94   : > { %v331_v51 = vpop.permute.xlu0 %330  ;;  %v326_v57 = vpop.permute.xlu1 %325 }
  0x98   : > { %v321_v55 = vpop.permute.xlu0 %320  ;;  %v311_v4 = vpop.permute.xlu1 %310 }
  0x9c   : > { %v316_v62 = vpop.permute.xlu0 %315 }
  0x9d   : > { %v301_v23 = vpop.permute.xlu1 %300 }
  0xa0   : > { %v306_v16 = vpop.permute.xlu0 %305 }
  0xe1   : > { %v410_v44 = vpop.f32.mrf.mxu0 }
  0xe2   : > { %v411_v33 = vadd.f32 %v410_v44, %v301_v23  ;;  %v1099_v44 = vld [vmem:[%s1492_s3 + $0x18] sm:$0xff]  }
  0xe3   : > { %v412_v45 = vpop.f32.mrf.mxu0 }
  0xe4   : > { %v413_v26 = vadd.f32 %v412_v45, %v301_v23  ;;  %v447_v39 = vmax.f32 %v411_v33, 0.0  ;;  %v1100_v45 = vld [vmem:[%s1492_s3 + $0x20] sm:$0xff]  }
  0xe5   : > { %v414_v46 = vpop.f32.mrf.mxu0 }
  0xe6   : > { %v415_v28 = vadd.f32 %v414_v46, %v306_v16  ;;  %v448_v35 = vmax.f32 %v413_v26, 0.0  ;;  %v1101_v46 = vld [vmem:[%s1492_s3 + $0x28] sm:$0xff]  }
  0xe7   : > { %v416_v47 = vpop.f32.mrf.mxu0 }
  0xe8   : > { %v417_v19 = vadd.f32 %v416_v47, %v306_v16  ;;  %v449_v36 = vmax.f32 %v415_v28, 0.0  ;;  %v1102_v47 = vld [vmem:[%s1492_s3 + $0x30] ss:$0 sps:$4 sm:$0x33]  }
  0xe9   : > { %v420_v48 = vpop.f32.mrf.mxu0 }
  0xea   : > { %v421_v24 = vadd.f32 %v420_v48, %v311_v4  ;;  %v450_v31 = vmax.f32 %v417_v19, 0.0  ;;  %v474_v40 = vpack.c.bf16 %v449_v36, %v447_v39  ;;  %v498_v48 = vpop.permute.xlu1 %497 }
  0xeb   : > { %v422_v49 = vpop.f32.mrf.mxu0 }
  0xec   : > { %v423_v13 = vadd.f32 %v422_v49, %v311_v4  ;;  %v451_v34 = vmax.f32 %v421_v24, 0.0  ;;  %v475_v38 = vpack.c.bf16 %v450_v31, %v448_v35  ;;  %v503_v49 = vpop.permute.xlu0 %502 }
  0xed   : > { %v424_v50 = vpop.f32.mrf.mxu0 }
  0xee   : > { %v425_v17 = vadd.f32 %v424_v50, %v316_v62  ;;  %v452_v27 = vmax.f32 %v423_v13, 0.0  ;;  %v508_v50 = vpop.permute.xlu1 %507 }
  0xef   : > { %v426_v52 = vpop.f32.mrf.mxu0 }
  0xf0   : > { %v427_v7 = vadd.f32 %v426_v52, %v316_v62  ;;  %v453_v29 = vmax.f32 %v425_v17, 0.0 }
  0xf1   : > { %v430_v53 = vpop.f32.mrf.mxu0 }
  0xf2   : > { %v431_v11 = vadd.f32 %v430_v53, %v321_v55  ;;  %v454_v20 = vmax.f32 %v427_v7, 0.0  ;;  %v476_v37 = vpack.c.bf16 %v453_v29, %v451_v34  ;;  %v765_v52 = vpop.permute.xlu1 %764 }
  0xf3   : > { %v432_v54 = vpop.f32.mrf.mxu0 }
  0xf4   : > { %v433_v0 = vadd.f32 %v432_v54, %v321_v55  ;;  %v455_v25 = vmax.f32 %v431_v11, 0.0  ;;  %v477_v32 = vpack.c.bf16 %v454_v20, %v452_v27 }
  0xf5   : > { %v434_v56 = vpop.f32.mrf.mxu0 }
  0xf6   : > { %v435_v5 = vadd.f32 %v434_v56, %v326_v57  ;;  %v456_v14 = vmax.f32 %v433_v0, 0.0  ;;  %v518_v54 = vpop.permute.xlu1 %517 }
  0xf7   : > { %v436_v58 = vpop.f32.mrf.mxu0 }
  0xf8   : > { %v437_v60 = vadd.f32 %v436_v58, %v326_v57  ;;  %v457_v18 = vmax.f32 %v435_v5, 0.0 }
  0xf9   : > { %v440_v59 = vpop.f32.mrf.mxu0 }
  0xfa   : > { %v441_v61 = vadd.f32 %v440_v59, %v331_v51  ;;  %v458_v8 = vmax.f32 %v437_v60, 0.0  ;;  %v478_v30 = vpack.c.bf16 %v457_v18, %v455_v25  ;;  %v523_v56 = vpop.permute.xlu1 %522 }
  0xfb   : > { %v442_v63 = vpop.f32.mrf.mxu0 }
  0xfc   : > { %v459_v2 = vmax.f32 %v441_v61, 0.0  ;;  %v443_v3 = vadd.f32 %v442_v63, %v331_v51  ;;  %v479_v21 = vpack.c.bf16 %v458_v8, %v456_v14  ;;  %v513_v51 = vpop.permute.xlu0 %512 }
  0xfd   : > { %v444_v6 = vpop.f32.mrf.mxu0 }
  0xfe   : > { %v480_v9 = vpack.c.bf16 %v459_v2, %v459_v2  ;;  %v460_v10 = vmax.f32 %v443_v3, 0.0  ;;  %v528_v58 = vpop.permute.xlu1 %527 }
  0xff   : > { %v445_v12 = vpop.f32.mrf.mxu0 }
 0x100   : > { %v481_v15 = vpack.c.bf16 %v460_v10, %v460_v10  ;;  %v617_v22 = vsel %vm615_vm2, %v480_v9, 0  ;;  %v770_v53 = vpop.permute.xlu0 %769 }
 0x102   : > { %1025 = vmatprep.subr.msk.bf16.mxu0 %vm615_vm2, %v481_v15  ;;  %1039 = vmatprep.subr.msk.bf16.mxu1 %vm615_vm2, %v481_v15 }
 0x103   : > { %631 = vmatpush1.bf16.msra.mxu0 %v617_v22  ;;  %1043 = vmatpush1.bf16.msra.mxu1 %v617_v22 }
 0x104   : > { %632 = vmatprep.subr.bf16.mxu0 %v479_v21  ;;  %1040 = vmatprep.subr.bf16.mxu1 %v479_v21  ;;  %v775_v55 = vpop.permute.xlu0 %774 }
 0x107   : > { %633 = vmatpush1.bf16.msra.mxu0 %v478_v30  ;;  %1044 = vmatpush1.bf16.msra.mxu1 %v478_v30 }
 0x108   : > { %634 = vmatprep.subr.bf16.mxu0 %v477_v32  ;;  %1041 = vmatprep.subr.bf16.mxu1 %v477_v32  ;;  %v1421_v57 = vpop.permute.xlu0 %779 }
 0x10b   : > { %635 = vmatpush1.bf16.msra.mxu0 %v476_v37  ;;  %1045 = vmatpush1.bf16.msra.mxu1 %v476_v37 }
 0x10c   : > { %636 = vmatprep.subr.bf16.mxu0 %v475_v38  ;;  %1042 = vmatprep.subr.bf16.mxu1 %v475_v38  ;;  %v1423_v59 = vpop.permute.xlu0 %784 }
 0x10f   : > { %637 = vmatpush1.bf16.msra.mxu0 %v474_v40  ;;  %1046 = vmatpush1.bf16.msra.mxu1 %v474_v40 }
 0x110   : > { %v1427_v60 = vpop.permute.xlu0 %789 }
 0x112   : > { %1026 = vmatmul.mubr.msk.bf16.vlgmr.msra.gmra.mxu0 %vm593_vm3, %v1096_v41  ;;  %1028 = vmatmul.mubr.msk.bf16.vlgmr.msra.gmra.mxu1 %vm593_vm3, %v1097_v42 }
 0x113   : > { %664 = vmatprep.mubr.bf16.mxu0 %v1165_v1  ;;  %684 = vmatprep.mubr.bf16.mxu1 %v1165_v1 }
 0x114   : > { %v1431_v5 = vpop.permute.xlu0 %794 }
 0x118   : > { %v1435_v24 = vpop.permute.xlu0 %799 }
 0x11a   : > { %1027 = vmatmul.mubr.msk.bf16.gmra.mxu0 %vm593_vm3, %v1098_v43  ;;  %1029 = vmatmul.mubr.msk.bf16.gmra.mxu1 %vm593_vm3, %v1099_v44 }
 0x11b   : > { %694 = vmatprep.mubr.bf16.mxu1 %v1165_v1 }
 0x122   : > { %1030 = vmatmul.mubr.msk.bf16.gmra.mxu1 %vm593_vm3, %v1100_v45 }
 0x123   : > { %704 = vmatprep.mubr.bf16.mxu1 %v1165_v1 }
 0x12a   : > { %1031 = vmatmul.mubr.msk.bf16.gmra.mxu1 %vm593_vm3, %v1101_v46 }
 0x12b   : > { %714 = vmatprep.mubr.bf16.mxu1 %v1165_v1  ;;  %v1425_v1 = vpop.permute.xlu1 %532 }
 0x12f   : > { %v1429_v2 = vpop.permute.xlu1 %537 }
 0x132   : > { %1032 = vmatmul.mubr.msk.bf16.gmra.mxu1 %vm593_vm3, %v1102_v47 }
 0x133   : > { %v1433_v15 = vpop.permute.xlu1 %542 }
 0x137   : > { %v548_v42 = vpop.permute.xlu1 %547 }
 0x1d2   : > { %v656_v61 = vpop.f32.mrf.mxu0  ;;  %v676_v62 = vpop.f32.mrf.mxu1 }
 0x1d3   : > { %v657_v6 = vadd.f32 %v656_v61, %v498_v48  ;;  %v677_v17 = vadd.f32 %v676_v62, %v518_v54 }
 0x1d4   : > { %v658_v63 = vpop.f32.mrf.mxu0  ;;  %v678_v0 = vpop.f32.mrf.mxu1 }
 0x1d5   : > { %v659_v7 = vadd.f32 %v658_v63, %v498_v48  ;;  %v723_v16 = vmax.f32 %v657_v6, 0.0  ;;  %v679_v21 = vadd.f32 %v678_v0, %v518_v54  ;;  %v731_v33 = vmax.f32 %v677_v17, 0.0 }
 0x1d6   : > { %v660_v3 = vpop.f32.mrf.mxu0  ;;  %v680_v4 = vpop.f32.mrf.mxu1 }
 0x1d7   : > { %v661_v8 = vadd.f32 %v660_v3, %v503_v49  ;;  %v724_v20 = vmax.f32 %v659_v7, 0.0  ;;  %v681_v27 = vadd.f32 %v680_v4, %v523_v56  ;;  %v827_v32 = vmul.f32 %v765_v52, %v723_v16 }
 0x1d8   : > { %v662_v9 = vpop.f32.mrf.mxu0  ;;  %v682_v10 = vpop.f32.mrf.mxu1  ;;  %v732_v37 = vmax.f32 %v679_v21, 0.0  ;;  %v835_v63 = vmul.f32 %v1423_v59, %v731_v33 }
 0x1d9   : > { %v663_v11 = vadd.f32 %v662_v9, %v503_v49  ;;  %v725_v12 = vmax.f32 %v661_v8, 0.0  ;;  %v828_v36 = vmul.f32 %v765_v52, %v724_v20  ;;  %v683_v38 = vadd.f32 %v682_v10, %v523_v56  ;;  %v805_v56 = vpop.permute.xlu0 %804 }
 0x1da   : > { %v666_v13 = vpop.f32.mrf.mxu0  ;;  %v686_v14 = vpop.f32.mrf.mxu1  ;;  %v733_v47 = vmax.f32 %v681_v27, 0.0  ;;  %v836_v8 = vmul.f32 %v1423_v59, %v732_v37 }
 0x1db   : > { %v726_v18 = vmax.f32 %v663_v11, 0.0  ;;  %v667_v19 = vadd.f32 %v666_v13, %v508_v50  ;;  %v829_v25 = vmul.f32 %v770_v53, %v725_v12  ;;  %v687_v44 = vadd.f32 %v686_v14, %v528_v58  ;;  %v553_v13 = vpop.permute.xlu1 %552 }
 0x1dc   : > { %v668_v22 = vpop.f32.mrf.mxu0  ;;  %v688_v23 = vpop.f32.mrf.mxu1  ;;  %v734_v0 = vmax.f32 %v683_v38, 0.0  ;;  %v837_v9 = vmul.f32 %v1427_v60, %v733_v47 }
 0x1dd   : > { %v727_v26 = vmax.f32 %v667_v19, 0.0  ;;  %v830_v28 = vmul.f32 %v770_v53, %v726_v18  ;;  %v669_v29 = vadd.f32 %v668_v22, %v508_v50  ;;  %v853_v43 = vadd.f32 %v829_v25, %v827_v32  ;;  %v810_v25 = vpop.permute.xlu0 %809 }
 0x1de   : > { %v670_v30 = vpop.f32.mrf.mxu0  ;;  %v690_v31 = vpop.f32.mrf.mxu1  ;;  %v689_v50 = vadd.f32 %v688_v23, %v528_v58  ;;  %v735_v6 = vmax.f32 %v687_v44, 0.0  ;;  %v838_v18 = vmul.f32 %v1427_v60, %v734_v0 }
 0x1df   : > { %v831_v34 = vmul.f32 %v775_v55, %v727_v26  ;;  %v671_v35 = vadd.f32 %v670_v30, %v513_v51  ;;  %v728_v39 = vmax.f32 %v669_v29, 0.0  ;;  %v872_v48 = vadd.f32 %v830_v28, %v828_v36 }
 0x1e0   : > { %v672_v40 = vpop.f32.mrf.mxu0  ;;  %v692_v41 = vpop.f32.mrf.mxu1  ;;  %v691_v52 = vadd.f32 %v690_v31, %v1425_v1  ;;  %v736_v10 = vmax.f32 %v689_v50, 0.0 }
 0x1e1   : > { %v729_v45 = vmax.f32 %v671_v35, 0.0  ;;  %v673_v46 = vadd.f32 %v672_v40, %v513_v51  ;;  %v832_v49 = vmul.f32 %v775_v55, %v728_v39  ;;  %v854_v54 = vadd.f32 %v853_v43, %v831_v34  ;;  %v558_v35 = vpop.permute.xlu1 %557 }
 0x1e2   : > { %v696_v53 = vpop.f32.mrf.mxu1  ;;  %v693_v3 = vadd.f32 %v692_v41, %v1425_v1  ;;  %v737_v16 = vmax.f32 %v691_v52, 0.0 }
 0x1e3   : > { %v833_v61 = vmul.f32 %v1421_v57, %v729_v45  ;;  %v730_v62 = vmax.f32 %v673_v46, 0.0  ;;  %v697_v4 = vadd.f32 %v696_v53, %v1429_v2  ;;  %v873_v7 = vadd.f32 %v872_v48, %v832_v49  ;;  %v815_v46 = vpop.permute.xlu0 %814 }
 0x1e4   : > { %v698_v51 = vpop.f32.mrf.mxu1  ;;  %v738_v19 = vmax.f32 %v693_v3, 0.0  ;;  %v841_v28 = vmul.f32 %v1435_v24, %v737_v16 }
 0x1e5   : > { %v855_v55 = vadd.f32 %v854_v54, %v833_v61  ;;  %v834_v58 = vmul.f32 %v1421_v57, %v730_v62  ;;  %v699_v11 = vadd.f32 %v698_v51, %v1429_v2  ;;  %v739_v20 = vmax.f32 %v697_v4, 0.0  ;;  %v820_v62 = vpop.permute.xlu1 %819 }
 0x1e6   : > { %v700_v12 = vpop.f32.mrf.mxu1  ;;  %v839_v57 = vmul.f32 %v1431_v5, %v735_v6  ;;  %v840_v2 = vmul.f32 %v1431_v5, %v736_v10  ;;  %v842_v60 = vmul.f32 %v1435_v24, %v738_v19  ;;  %v897_v19 = vlaneseq }
 0x1e7   : > { %v856_v14 = vadd.f32 %v855_v55, %v835_v63  ;;  %v874_v1 = vadd.f32 %v873_v7, %v834_v58  ;;  %v701_v17 = vadd.f32 %v700_v12, %v1433_v15  ;;  %v740_v26 = vmax.f32 %v699_v11, 0.0  ;;  %v825_v55 = vpop.permute.xlu0 %824 }
 0x1e8   : > { %v702_v21 = vpop.f32.mrf.mxu1  ;;  %v843_v32 = vmul.f32 %v805_v56, %v739_v20  ;;  %vm923_vm4 = vcmp.lt.s32.totalorder %v897_v19, 256 }
 0x1e9   : > { %v857_v59 = vadd.f32 %v856_v14, %v837_v9  ;;  %v875_v22 = vadd.f32 %v874_v1, %v836_v8  ;;  %v703_v23 = vadd.f32 %v702_v21, %v1433_v15  ;;  %v741_v31 = vmax.f32 %v701_v17, 0.0 }
 0x1ea   : > { %v706_v27 = vpop.f32.mrf.mxu1  ;;  %v844_v39 = vmul.f32 %v805_v56, %v740_v26 }
 0x1eb   : > { %v858_v29 = vadd.f32 %v857_v59, %v839_v57  ;;  %v876_v30 = vadd.f32 %v875_v22, %v838_v18  ;;  %v707_v33 = vadd.f32 %v706_v27, %v548_v42  ;;  %v742_v38 = vmax.f32 %v703_v23, 0.0 }
 0x1ec   : > { %v708_v34 = vpop.f32.mrf.mxu1  ;;  %v845_v44 = vmul.f32 %v810_v25, %v741_v31  ;;  %v898_v22 = vshrl.u32 %v897_v19, 7 }
 0x1ed   : > { %v859_v36 = vadd.f32 %v858_v29, %v841_v28  ;;  %v877_v37 = vadd.f32 %v876_v30, %v840_v2  ;;  %v709_v15 = vadd.f32 %v708_v34, %v548_v42  ;;  %v743_v40 = vmax.f32 %v707_v33, 0.0 }
 0x1ee   : > { %v710_v5 = vpop.f32.mrf.mxu1  ;;  %v846_v50 = vmul.f32 %v810_v25, %v742_v38  ;;  %v1166_v2 = vmov 1966171168   ;;  %v899_v29 = vsub.s32 0, %v898_v22 }
 0x1ef   : > { %v878_v41 = vadd.f32 %v877_v37, %v842_v60  ;;  %v860_v43 = vadd.f32 %v859_v36, %v843_v32  ;;  %v711_v45 = vadd.f32 %v710_v5, %v553_v13  ;;  %v744_v47 = vmax.f32 %v709_v15, 0.0  ;;  %v895_v60 = vpop.permute.xlu1 %894 }
 0x1f0   : > { %v712_v48 = vpop.f32.mrf.mxu1  ;;  %v847_v54 = vmul.f32 %v815_v46, %v743_v40  ;;  %v907_v26 = vunpack.c.l.s4 %v1166_v2 }
 0x1f1   : > { %v879_v49 = vadd.f32 %v878_v41, %v844_v39  ;;  %v861_v24 = vadd.f32 %v860_v43, %v845_v44  ;;  %v745_v53 = vmax.f32 %v711_v45, 0.0  ;;  %v713_v61 = vadd.f32 %v712_v48, %v553_v13 }
 0x1f2   : > { %v716_v52 = vpop.f32.mrf.mxu1  ;;  %v848_v0 = vmul.f32 %v815_v46, %v744_v47  ;;  %v908_v32 = vunpack.c.0.s8 %v907_v26 }
 0x1f3   : > { %v880_v63 = vadd.f32 %v879_v49, %v846_v50  ;;  %v717_v42 = vadd.f32 %v716_v52, %v558_v35  ;;  %v862_v56 = vadd.f32 %v861_v24, %v847_v54  ;;  %v849_v3 = vmul.f32 %v820_v62, %v745_v53 }
 0x1f4   : > { %v746_v4 = vmax.f32 %v713_v61, 0.0  ;;  %v718_v51 = vpop.f32.mrf.mxu1  ;;  %v911_v37 = vsub.s32 %v908_v32, %v898_v22 }
 0x1f5   : > { %v747_v6 = vmax.f32 %v717_v42, 0.0  ;;  %v719_v7 = vadd.f32 %v718_v51, %v558_v35  ;;  %v881_v58 = vadd.f32 %v880_v63, %v848_v0  ;;  %v863_v12 = vadd.f32 %v862_v56, %v849_v3 }
 0x1f6   : > { %v850_v8 = vmul.f32 %v820_v62, %v746_v4  ;;  %v720_v9 = vpop.f32.mrf.mxu1  ;;  %v900_v35 = vrot.slane %v895_v60, %v899_v29 }
 0x1f7   : > { %v851_v10 = vmul.f32 %v825_v55, %v747_v6  ;;  %v748_v11 = vmax.f32 %v719_v7, 0.0 }
 0x1f8   : > { %v721_v14 = vpop.f32.mrf.mxu1  ;;  %v882_v1 = vadd.f32 %v881_v58, %v850_v8 }
 0x1f9   : > { %v864_v13 = vsel %vm369_vm0, %v851_v10, 0.0  ;;  %v852_v16 = vmul.f32 %v825_v55, %v748_v11 }
 0x1fa   : > { %v865_v17 = vadd.f32 %v864_v13, %v863_v12 }
 0x1fb   : > { %v883_v18 = vsel %vm369_vm0, %v852_v16, 0.0 }
 0x1fc   : > { %v866_v20 = vrot.slane %v865_v17, 4  ;;  %v884_v21 = vadd.f32 %v883_v18, %v882_v1 }
 0x1fe   : > { %v867_v57 = vadd.f32 %v866_v20, %v865_v17  ;;  %v885_v59 = vrot.slane %v884_v21, 4 }
 0x200   : > { %v868_v23 = vrot.slane %v867_v57, 2  ;;  %v886_v25 = vadd.f32 %v885_v59, %v884_v21 }
 0x202   : > { %v869_v27 = vadd.f32 %v868_v23, %v867_v57  ;;  %v887_v28 = vrot.slane %v886_v25, 2 }
 0x204   : > { %v870_v30 = vrot.slane %v869_v27, 1  ;;  %v888_v31 = vadd.f32 %v887_v28, %v886_v25 }
 0x206   : > { %v871_v33 = vadd.f32 %v870_v30, %v869_v27  ;;  %v889_v34 = vrot.slane %v888_v31, 1 }
 0x208   : > { %v890_v36 = vadd.f32 %v889_v34, %v888_v31  ;;  %v901_v38 = vadd.f32 %v900_v35, %v871_v33 }
 0x20a   : > { %v902_v15 = vadd.f32 %v900_v35, %v890_v36 }
 0x20c   : > { %v905_v39 = vcombine.low %v901_v38, %v902_v15 }
 0x20e   : > { %v912_v40 = vrot.slane %v905_v39, %v911_v37 }
 0x210   : > { %v919_v5 = vrot.slane %v912_v40, %v911_v37 }
 0x212   : > { %925 = vst.msk [vmem:[%s274_s20] sm:$0x3] %vm923_vm4, %v919_v5 }
 0x213   : > { %1116 = shalt.err (!%p1113_p3)
}
 0x214   : > { %s1117_s14 = scalar_lea.hbm %s939_s24, 32  ;;  %s1121_s17 = scalar_lea.hbm %s1496_s7, 64 }
 0x215   : > { %p1118_p4 = scmp.ne.s32.totalorder %s939_s24, %s1117_s14  ;;  %p1122_p9 = scmp.lt.s32.totalorder %s939_s24, %s1496_s7 }
 0x216   : > { %p1123_p10 = scmp.lt.s32.totalorder %s1121_s17, %s1117_s14 }
 0x217   : > { %p1119_p7 = pnand %p1118_p4, %p1249_p5 }
 0x218   : > { %p1124_p11 = por %p1123_p10, %p1122_p9 }
 0x219   : > { %p1120_p8 = pneg %p1119_p7 }
 0x21b   : > { %p1125_p12 = pnand %p1124_p11, %p1120_p8 }
 0x21d   : > { %1128 = shalt.err (!%p1125_p12)
}
 0x21e   : > { %1047 = dma.vmem_to_hbm [thread:$0]  (%p1249_p5), %s942_s21, 32, %s939_s24, %s927_s25  }
 0x21f PF: > { %p1053_p13 = scmp.ge.s32.totalorder %s1163_s29, 2  ;;  %s953_s20 = sand.u32 1, %s1151_s26  }
 0x220   : > { %s954_s22 = scalar_lea.sflag [#allocation4], %s953_s20 }
 0x221   : > { %p1050_p0 = pnand %p1053_p13, %p1253_p6 }
 0x223   : > { %p1051_p1 = pneg %p1050_p0 }
 0x225   : > { %1146 = dma.done.wait (%p1051_p1), %s954_s22, 32  }
 0x226   : > { %1148 = vsyncadd (%p1051_p1), %s954_s22, 4294967264  ;;  %p19_p2 = scmp.ge.s32.totalorder %s1236_s8, 4   ;;  %s1499_s26 = smov %s1155_s27 }
 0x227   : > { %s1500_s27 = smov %s1159_s28  ;;  %s1501_s28 = smov %s1247_s11 }
 0x228   : > { %s1502_s29 = smov %s1236_s8  ;;  %21 = sbr.rel (!%p19_p2) target bundleno = 6 (0x6), region = 83 }
 0x22d   :  { %959 = vsyncpa [#allocation4], 1 }
 0x22e   :  { %961 = vsyncpa [#allocation4 + $0x1], 1 }

</bundles_post_ra>
